<compile_context>
chip_gen: v7x
topology: tpu7x:2x2x1
jax: 0.10.0
libtpu: 0.0.40
codegen_flags: <defaults>
</compile_context>

<pallas_src>
import functools

import jax
import jax.numpy as jnp
from jax import lax
from jax.experimental import pallas as pl
from jax.experimental.pallas import tpu as pltpu

NUM_CLASSES = 8
P_POW = 2        # module default; the closed-form algebra below assumes p == 2
SMOOTH = 1       # unused by the reference forward pass


def _round_up(x, m):
    return ((x + m - 1) // m) * m


def _cdiv(a, b):
    return -(-a // b)


def _binary_partial_kernel(pred_ref, hot_ref, out_ref, s2_ref, sd_ref, *, n_valid):
    """One (batch b, split s, tile t) grid step.

    pred_ref: (1, tile_rows, 128) logits, flat class-major layout (lane l -> class l%8)
    hot_ref : (1, tile_rows, 128) int8 one-hot values, same flat layout
    out_ref : (1, 1, 2, 128) f32; row 0 = lane partials of sum(p^2), row 1 = sum(p*onehot)
    s2_ref, sd_ref: (1, 128) f32 running lane-partial accumulators (scratch)
    """
    t = pl.program_id(2)
    n_t = pl.num_programs(2)

    @pl.when(t == 0)
    def _init():
        s2_ref[...] = jnp.zeros_like(s2_ref)
        sd_ref[...] = jnp.zeros_like(sd_ref)

    rows = pred_ref.shape[1]
    blk = pl.program_id(1) * n_t + t            # logical row-block index
    base = blk * (rows * 128)                   # first flat element of this block

    x = pred_ref[0].astype(jnp.float32)         # (rows, 128)
    p = jnp.tanh(x * 0.5) * 0.5 + 0.5           # sigmoid via a single EUP op
    hot = hot_ref[0]                            # (rows, 128) int8

    def _accumulate(pv):
        s2_ref[...] += jnp.sum(pv * pv, axis=0, keepdims=True)
        sd_ref[...] += jnp.sum(jnp.where(hot != 0, pv, 0.0), axis=0, keepdims=True)

    fully_valid = base + rows * 128 <= n_valid

    @pl.when(fully_valid)
    def _fast():                                # common path: no masking cost
        _accumulate(p)

    @pl.when(jnp.logical_not(fully_valid))
    def _ragged():                              # tail / out-of-range blocks: mask
        off = (lax.broadcasted_iota(jnp.int32, (rows, 128), 0) * 128
               + lax.broadcasted_iota(jnp.int32, (rows, 128), 1))
        _accumulate(jnp.where(off < n_valid - base, p, 0.0))

    @pl.when(t == n_t - 1)
    def _finalize():
        out_ref[0, 0, 0:1, :] = s2_ref[...]
        out_ref[0, 0, 1:2, :] = sd_ref[...]


def binary_loss(predict, target, *, reduction="mean", block_bytes=4 * 1024 * 1024):
    """predict: (B, ..., 8) class-last logits (any float dtype); target: (B, ...) ints in [0, 8)."""
    assert predict.shape[0] == target.shape[0], "predict & target batch size don't match"
    # Class-last layout assumed (matches F.one_hot appending the class axis, the only
    # layout for which the reference's flattened element pairing is a real dice loss).
    assert predict.shape[-1] == NUM_CLASSES
    B = predict.shape[0]

    pred = predict.reshape(B, -1, NUM_CLASSES)           # (B, N, 8) -- free reshape
    tgt = target.reshape(B, -1)                          # (B, N)
    N = pred.shape[1]
    assert tgt.shape[1] == N, "predict & target spatial sizes don't match"
    n_valid = N * NUM_CLASSES                            # true flat element count

    # Fold the flat class-major axis into 128-wide lanes: needs token count % 16 == 0.
    n16 = _round_up(max(N, 16), 16)
    if n16 != N:
        pred = jnp.pad(pred, ((0, 0), (0, n16 - N), (0, 0)))
        tgt = jnp.pad(tgt, ((0, 0), (0, n16 - N)))

    # int8 one-hot values streamed alongside the logits (~8 B/token, fused compare+cast).
    hot = (tgt[..., None] == jnp.arange(NUM_CLASSES, dtype=tgt.dtype)).astype(jnp.int8)

    rows = (n16 * NUM_CLASSES) // 128                    # = n16 // 16
    pred_flat = pred.reshape(B, rows, 128)               # free reshape (contiguous)
    hot_flat = hot.reshape(B, rows, 128)

    if rows < 32:                                        # tiny inputs: pad to one min tile
        pred_flat = jnp.pad(pred_flat, ((0, 0), (0, 32 - rows), (0, 0)))
        hot_flat = jnp.pad(hot_flat, ((0, 0), (0, 32 - rows), (0, 0)))
        rows = 32

    bytes_per_row = 128 * pred_flat.dtype.itemsize
    max_rows = max(32, (block_bytes // bytes_per_row) // 32 * 32)
    tile_rows = int(min(max_rows, (rows // 32) * 32))    # multiple of 32: safe for i8/bf16/f32
    k_blocks = _cdiv(rows, tile_rows)                    # row blocks per batch element
    n_splits = 2 if k_blocks >= 2 else 1                 # keep both v7x TCs busy at B == 1
    tiles = _cdiv(k_blocks, n_splits)

    def in_index_map(b, s, t):
        blk = s * tiles + t
        # Split rounding can create fully out-of-range steps; clamp onto the previous
        # block (same index -> the pipeline elides the re-fetch) and let the in-kernel
        # validity mask zero their contribution.
        return (b, jnp.minimum(blk, k_blocks - 1), 0)

    kernel = functools.partial(_binary_partial_kernel, n_valid=n_valid)

    partials = pl.pallas_call(
        kernel,
        out_shape=jax.ShapeDtypeStruct((B, n_splits, 2, 128), jnp.float32),
        grid_spec=pltpu.PrefetchScalarGridSpec(
            num_scalar_prefetch=0,
            grid=(B, n_splits, tiles),
            in_specs=[
                pl.BlockSpec((1, tile_rows, 128), in_index_map),   # logits (native dtype)
                pl.BlockSpec((1, tile_rows, 128), in_index_map),   # int8 one-hot
            ],
            out_specs=pl.BlockSpec((1, 1, 2, 128), lambda b, s, t: (b, s, 0, 0)),
            scratch_shapes=[
                pltpu.VMEM((1, 128), jnp.float32),   # lane partials of sum(p^2)
                pltpu.VMEM((1, 128), jnp.float32),   # lane partials of sum(p*onehot)
            ],
        ),
        compiler_params=pltpu.CompilerParams(
            dimension_semantics=("parallel", "parallel", "arbitrary"),
            vmem_limit_bytes=48 * 1024 * 1024,       # fits v7x's 64 MiB; generous on v5e/v6e
        ),
    )(pred_flat, hot_flat)

    # Tiny epilogue: combine split/lane partials, finish num/den and the reduction.
    s2 = jnp.sum(partials[:, :, 0, :], axis=(1, 2))      # (B,) sum(sigmoid^2)
    sd = jnp.sum(partials[:, :, 1, :], axis=(1, 2))      # (B,) sum(sigmoid * onehot)
    n_tok = jnp.float32(N)                               # sum(onehot^2) == true token count
    loss = (s2 - 2.0 * sd + n_tok) / (s2 + n_tok)
    if reduction == "mean":
        return loss.mean()
    if reduction == "sum":
        return loss.sum()
    if reduction == "none":
        return loss
    raise ValueError(f"Unexpected reduction {reduction}")


def _reference(predict, target, reduction="mean"):
    # Plain-JAX reference mirroring the PyTorch forward exactly.
    b = predict.shape[0]
    onehot = jax.nn.one_hot(target.reshape(b, -1), NUM_CLASSES, dtype=jnp.float32)
    pred = jax.nn.sigmoid(predict.astype(jnp.float32)).reshape(b, -1)
    onehot = onehot.reshape(b, -1)
    num = jnp.sum((pred - onehot) ** P_POW, axis=1)
    den = jnp.sum(pred ** P_POW + onehot ** P_POW, axis=1)
    loss = num / den
    if reduction == "mean":
        return loss.mean()
    if reduction == "sum":
        return loss.sum()
    return loss


if __name__ == "__main__":
    key = jax.random.PRNGKey(0)
    ks = jax.random.split(key, 6)

    # Case 1: (B, H, W, 8) logits, N=256 tokens -> single tile per batch element.
    B, H, W = 2, 16, 16
    predict = jax.random.normal(ks[0], (B, H, W, NUM_CLASSES), dtype=jnp.float32)
    target = jax.random.randint(ks[1], (B, H, W), 0, NUM_CLASSES, dtype=jnp.int32)
    loss = binary_loss(predict, target)
    jax.block_until_ready(loss)
    ref = _reference(predict, target)
    assert jnp.allclose(loss, ref, rtol=5e-5, atol=1e-6), (loss, ref)

    # Case 2: ragged token count (N=120, not a multiple of 16) -> in-kernel masking path.
    predict2 = jax.random.normal(ks[2], (B, 10, 12, NUM_CLASSES), dtype=jnp.float32)
    target2 = jax.random.randint(ks[3], (B, 10, 12), 0, NUM_CLASSES, dtype=jnp.int32)
    loss2 = binary_loss(predict2, target2, reduction="none")
    jax.block_until_ready(loss2)
    ref2 = _reference(predict2, target2, reduction="none")
    assert jnp.allclose(loss2, ref2, rtol=5e-5, atol=1e-6), (loss2, ref2)

    # Case 3: multi-tile accumulation + token-split axis + ragged last block + clamped
    # out-of-range split step (small block_bytes forces tile_rows=32, K=3 row blocks).
    predict3 = jax.random.normal(ks[4], (1, 32, 40, NUM_CLASSES), dtype=jnp.float32)
    target3 = jax.random.randint(ks[5], (1, 32, 40), 0, NUM_CLASSES, dtype=jnp.int32)
    loss3 = binary_loss(predict3, target3, block_bytes=16 * 1024)
    jax.block_until_ready(loss3)
    ref3 = _reference(predict3, target3)
    assert jnp.allclose(loss3, ref3, rtol=5e-5, atol=1e-6), (loss3, ref3)

    print("KERNEL_OK")
</pallas_src>

<mosaic_0001>
module attributes {stable_mosaic.version = 11 : i64} {
  func.func @_binary_partial_kernel(%arg0: i32, %arg1: i32, %arg2: i32, %arg3: memref<1x32x128xf32, #tpu.memory_space<vmem>>, %arg4: memref<1x32x128xi8, #tpu.memory_space<vmem>>, %arg5: memref<1x1x2x128xf32, #tpu.memory_space<vmem>>, %arg6: memref<1x128xf32, #tpu.memory_space<vmem>>, %arg7: memref<1x128xf32, #tpu.memory_space<vmem>>) attributes {dimension_semantics = [#tpu.dimension_semantics<parallel>, #tpu.dimension_semantics<parallel>, #tpu.dimension_semantics<arbitrary>], iteration_bounds = array<i64: 2, 1, 1>, scalar_prefetch = 0 : i64, scratch_operands = 2 : i64, tpu.core_type = #tpu.core_type<tc>, window_params = [{transform_indices = @transform_0, window_bounds = array<i64: 1, 32, 128>}, {transform_indices = @transform_1, window_bounds = array<i64: 1, 32, 128>}, {transform_indices = @transform_2, window_bounds = array<i64: 1, 1, 2, 128>}]} {
    %c0_i32 = arith.constant 0 : i32
    %0 = arith.cmpi eq, %arg2, %c0_i32 : i32
    %1 = arith.extui %0 : i1 to i32
    %c0_i32_0 = arith.constant 0 : i32
    %2 = arith.cmpi ne, %1, %c0_i32_0 : i32
    scf.if %2 {
      %cst_13 = arith.constant 0.000000e+00 : f32
      %27 = vector.broadcast %cst_13 : f32 to vector<1x128xf32>
      %c0_14 = arith.constant 0 : index
      %c0_15 = arith.constant 0 : index
      %28 = vector.load %arg6[%c0_14, %c0_15] : memref<1x128xf32, #tpu.memory_space<vmem>>, vector<1x128xf32>
      tpu.vector_store %arg6[%c0_14, %c0_15], %27 {strides = array<i32>} : memref<1x128xf32, #tpu.memory_space<vmem>>, vector<1x128xf32>,
      %cst_16 = arith.constant 0.000000e+00 : f32
      %29 = vector.broadcast %cst_16 : f32 to vector<1x128xf32>
      %c0_17 = arith.constant 0 : index
      %c0_18 = arith.constant 0 : index
      %30 = vector.load %arg7[%c0_17, %c0_18] : memref<1x128xf32, #tpu.memory_space<vmem>>, vector<1x128xf32>
      tpu.vector_store %arg7[%c0_17, %c0_18], %29 {strides = array<i32>} : memref<1x128xf32, #tpu.memory_space<vmem>>, vector<1x128xf32>,
    } else {
    }
    %c1_i32 = arith.constant 1 : i32
    %3 = arith.muli %arg1, %c1_i32 : i32
    %4 = arith.addi %3, %arg2 : i32
    %c4096_i32 = arith.constant 4096 : i32
    %5 = arith.muli %4, %c4096_i32 : i32
    %c0 = arith.constant 0 : index
    %c0_1 = arith.constant 0 : index
    %c0_2 = arith.constant 0 : index
    %6 = vector.load %arg3[%c0, %c0_1, %c0_2] : memref<1x32x128xf32, #tpu.memory_space<vmem>>, vector<1x32x128xf32>
    %7 = vector.shape_cast %6 : vector<1x32x128xf32> to vector<32x128xf32>
    %cst = arith.constant 5.000000e-01 : f32
    %8 = vector.broadcast %cst : f32 to vector<32x128xf32>
    %9 = arith.mulf %7, %8 : vector<32x128xf32>
    %10 = math.tanh %9 : vector<32x128xf32>
    %cst_3 = arith.constant 5.000000e-01 : f32
    %11 = vector.broadcast %cst_3 : f32 to vector<32x128xf32>
    %12 = arith.mulf %10, %11 : vector<32x128xf32>
    %cst_4 = arith.constant 5.000000e-01 : f32
    %13 = vector.broadcast %cst_4 : f32 to vector<32x128xf32>
    %14 = arith.addf %12, %13 : vector<32x128xf32>
    %c0_5 = arith.constant 0 : index
    %c0_6 = arith.constant 0 : index
    %c0_7 = arith.constant 0 : index
    %15 = vector.load %arg4[%c0_5, %c0_6, %c0_7] : memref<1x32x128xi8, #tpu.memory_space<vmem>>, vector<1x32x128xi8>
    %16 = vector.shape_cast %15 : vector<1x32x128xi8> to vector<32x128xi8>
    %c4096_i32_8 = arith.constant 4096 : i32
    %17 = arith.addi %5, %c4096_i32_8 : i32
    %c2048_i32 = arith.constant 2048 : i32
    %18 = arith.cmpi sle, %17, %c2048_i32 : i32
    %19 = arith.extui %18 : i1 to i32
    %c0_i32_9 = arith.constant 0 : i32
    %20 = arith.cmpi ne, %19, %c0_i32_9 : i32
    scf.if %20 {
      %c0_13 = arith.constant 0 : index
      %c0_14 = arith.constant 0 : index
      %27 = vector.load %arg6[%c0_13, %c0_14] : memref<1x128xf32, #tpu.memory_space<vmem>>, vector<1x128xf32>
      %28 = arith.mulf %14, %14 : vector<32x128xf32>
      %cst_15 = arith.constant dense<0.000000e+00> : vector<128xf32>
      %29 = vector.multi_reduction <add>, %28, %cst_15 [0] : vector<32x128xf32> to vector<128xf32>
      %30 = vector.shape_cast %29 : vector<128xf32> to vector<1x128xf32>
      %31 = arith.addf %27, %30 : vector<1x128xf32>
      %c0_16 = arith.constant 0 : index
      %c0_17 = arith.constant 0 : index
      %32 = vector.load %arg6[%c0_16, %c0_17] : memref<1x128xf32, #tpu.memory_space<vmem>>, vector<1x128xf32>
      tpu.vector_store %arg6[%c0_16, %c0_17], %31 {strides = array<i32>} : memref<1x128xf32, #tpu.memory_space<vmem>>, vector<1x128xf32>,
      %c0_18 = arith.constant 0 : index
      %c0_19 = arith.constant 0 : index
      %33 = vector.load %arg7[%c0_18, %c0_19] : memref<1x128xf32, #tpu.memory_space<vmem>>, vector<1x128xf32>
      %c0_i8 = arith.constant 0 : i8
      %34 = vector.broadcast %c0_i8 : i8 to vector<32x128xi8>
      %35 = arith.cmpi ne, %16, %34 : vector<32x128xi8>
      %cst_20 = arith.constant 0.000000e+00 : f32
      %36 = vector.broadcast %cst_20 : f32 to vector<32x128xf32>
      %37 = arith.select %35, %14, %36 : vector<32x128xi1>, vector<32x128xf32>
      %cst_21 = arith.constant dense<0.000000e+00> : vector<128xf32>
      %38 = vector.multi_reduction <add>, %37, %cst_21 [0] : vector<32x128xf32> to vector<128xf32>
      %39 = vector.shape_cast %38 : vector<128xf32> to vector<1x128xf32>
      %40 = arith.addf %33, %39 : vector<1x128xf32>
      %c0_22 = arith.constant 0 : index
      %c0_23 = arith.constant 0 : index
      %41 = vector.load %arg7[%c0_22, %c0_23] : memref<1x128xf32, #tpu.memory_space<vmem>>, vector<1x128xf32>
      tpu.vector_store %arg7[%c0_22, %c0_23], %40 {strides = array<i32>} : memref<1x128xf32, #tpu.memory_space<vmem>>, vector<1x128xf32>,
    } else {
    }
    %true = arith.constant true
    %21 = arith.xori %18, %true : i1
    %22 = arith.extui %21 : i1 to i32
    %c0_i32_10 = arith.constant 0 : i32
    %23 = arith.cmpi ne, %22, %c0_i32_10 : i32
    scf.if %23 {
      %27 = tpu.iota {dimensions = array<i32: 0>} : vector<32x128xi32>
      %c128_i32 = arith.constant 128 : i32
      %28 = vector.broadcast %c128_i32 : i32 to vector<32x128xi32>
      %29 = arith.muli %27, %28 : vector<32x128xi32>
      %30 = tpu.iota {dimensions = array<i32: 1>} : vector<32x128xi32>
      %31 = arith.addi %29, %30 : vector<32x128xi32>
      %c2048_i32_13 = arith.constant 2048 : i32
      %32 = arith.subi %c2048_i32_13, %5 : i32
      %33 = vector.broadcast %32 : i32 to vector<32x128xi32>
      %34 = arith.cmpi slt, %31, %33 : vector<32x128xi32>
      %cst_14 = arith.constant 0.000000e+00 : f32
      %35 = vector.broadcast %cst_14 : f32 to vector<32x128xf32>
      %36 = arith.select %34, %14, %35 : vector<32x128xi1>, vector<32x128xf32>
      %c0_15 = arith.constant 0 : index
      %c0_16 = arith.constant 0 : index
      %37 = vector.load %arg6[%c0_15, %c0_16] : memref<1x128xf32, #tpu.memory_space<vmem>>, vector<1x128xf32>
      %38 = arith.mulf %36, %36 : vector<32x128xf32>
      %cst_17 = arith.constant dense<0.000000e+00> : vector<128xf32>
      %39 = vector.multi_reduction <add>, %38, %cst_17 [0] : vector<32x128xf32> to vector<128xf32>
      %40 = vector.shape_cast %39 : vector<128xf32> to vector<1x128xf32>
      %41 = arith.addf %37, %40 : vector<1x128xf32>
      %c0_18 = arith.constant 0 : index
      %c0_19 = arith.constant 0 : index
      %42 = vector.load %arg6[%c0_18, %c0_19] : memref<1x128xf32, #tpu.memory_space<vmem>>, vector<1x128xf32>
      tpu.vector_store %arg6[%c0_18, %c0_19], %41 {strides = array<i32>} : memref<1x128xf32, #tpu.memory_space<vmem>>, vector<1x128xf32>,
      %c0_20 = arith.constant 0 : index
      %c0_21 = arith.constant 0 : index
      %43 = vector.load %arg7[%c0_20, %c0_21] : memref<1x128xf32, #tpu.memory_space<vmem>>, vector<1x128xf32>
      %c0_i8 = arith.constant 0 : i8
      %44 = vector.broadcast %c0_i8 : i8 to vector<32x128xi8>
      %45 = arith.cmpi ne, %16, %44 : vector<32x128xi8>
      %cst_22 = arith.constant 0.000000e+00 : f32
      %46 = vector.broadcast %cst_22 : f32 to vector<32x128xf32>
      %47 = arith.select %45, %36, %46 : vector<32x128xi1>, vector<32x128xf32>
      %cst_23 = arith.constant dense<0.000000e+00> : vector<128xf32>
      %48 = vector.multi_reduction <add>, %47, %cst_23 [0] : vector<32x128xf32> to vector<128xf32>
      %49 = vector.shape_cast %48 : vector<128xf32> to vector<1x128xf32>
      %50 = arith.addf %43, %49 : vector<1x128xf32>
      %c0_24 = arith.constant 0 : index
      %c0_25 = arith.constant 0 : index
      %51 = vector.load %arg7[%c0_24, %c0_25] : memref<1x128xf32, #tpu.memory_space<vmem>>, vector<1x128xf32>
      tpu.vector_store %arg7[%c0_24, %c0_25], %50 {strides = array<i32>} : memref<1x128xf32, #tpu.memory_space<vmem>>, vector<1x128xf32>,
    } else {
    }
    %c0_i32_11 = arith.constant 0 : i32
    %24 = arith.cmpi eq, %arg2, %c0_i32_11 : i32
    %25 = arith.extui %24 : i1 to i32
    %c0_i32_12 = arith.constant 0 : i32
    %26 = arith.cmpi ne, %25, %c0_i32_12 : i32
    scf.if %26 {
      %c0_13 = arith.constant 0 : index
      %c0_14 = arith.constant 0 : index
      %27 = vector.load %arg6[%c0_13, %c0_14] : memref<1x128xf32, #tpu.memory_space<vmem>>, vector<1x128xf32>
      %c0_15 = arith.constant 0 : index
      %c0_16 = arith.constant 0 : index
      %c0_17 = arith.constant 0 : index
      %c0_18 = arith.constant 0 : index
      %28 = vector.load %arg5[%c0_15, %c0_16, %c0_17, %c0_18] : memref<1x1x2x128xf32, #tpu.memory_space<vmem>>, vector<1x1x1x128xf32>
      %29 = vector.shape_cast %28 : vector<1x1x1x128xf32> to vector<1x128xf32>
      %30 = vector.shape_cast %27 : vector<1x128xf32> to vector<1x1x1x128xf32>
      tpu.vector_store %arg5[%c0_15, %c0_16, %c0_17, %c0_18], %30 {strides = array<i32>} : memref<1x1x2x128xf32, #tpu.memory_space<vmem>>, vector<1x1x1x128xf32>,
      %c0_19 = arith.constant 0 : index
      %c0_20 = arith.constant 0 : index
      %31 = vector.load %arg7[%c0_19, %c0_20] : memref<1x128xf32, #tpu.memory_space<vmem>>, vector<1x128xf32>
      %c0_21 = arith.constant 0 : index
      %c0_22 = arith.constant 0 : index
      %c1 = arith.constant 1 : index
      %c0_23 = arith.constant 0 : index
      %32 = vector.load %arg5[%c0_21, %c0_22, %c1, %c0_23] : memref<1x1x2x128xf32, #tpu.memory_space<vmem>>, vector<1x1x1x128xf32>
      %33 = vector.shape_cast %32 : vector<1x1x1x128xf32> to vector<1x128xf32>
      %34 = vector.shape_cast %31 : vector<1x128xf32> to vector<1x1x1x128xf32>
      tpu.vector_store %arg5[%c0_21, %c0_22, %c1, %c0_23], %34 {strides = array<i32>} : memref<1x1x2x128xf32, #tpu.memory_space<vmem>>, vector<1x1x1x128xf32>,
    } else {
    }
    return
  }
  func.func @transform_0(%arg0: i32, %arg1: i32, %arg2: i32) -> (i32, i32, i32) {
    %c1_i32 = arith.constant 1 : i32
    %0 = arith.muli %arg1, %c1_i32 : i32
    %1 = arith.addi %0, %arg2 : i32
    %c0_i32 = arith.constant 0 : i32
    %2 = arith.minsi %1, %c0_i32 : i32
    %c0_i32_0 = arith.constant 0 : i32
    %c0_i32_1 = arith.constant 0 : i32
    return %arg0, %2, %c0_i32_0 : i32, i32, i32
  }
  func.func @transform_1(%arg0: i32, %arg1: i32, %arg2: i32) -> (i32, i32, i32) {
    %c1_i32 = arith.constant 1 : i32
    %0 = arith.muli %arg1, %c1_i32 : i32
    %1 = arith.addi %0, %arg2 : i32
    %c0_i32 = arith.constant 0 : i32
    %2 = arith.minsi %1, %c0_i32 : i32
    %c0_i32_0 = arith.constant 0 : i32
    %c0_i32_1 = arith.constant 0 : i32
    return %arg0, %2, %c0_i32_0 : i32, i32, i32
  }
  func.func @transform_2(%arg0: i32, %arg1: i32, %arg2: i32) -> (i32, i32, i32, i32) {
    %c0_i32 = arith.constant 0 : i32
    %c0_i32_0 = arith.constant 0 : i32
    %c0_i32_1 = arith.constant 0 : i32
    return %arg0, %arg1, %c0_i32, %c0_i32_0 : i32, i32, i32, i32
  }
}

</mosaic_0001>

<bundles_post_ra>
// kernel: tpu_custom_call.1
= control target key start
LH: loop header
LB: loop body
LE: loop exit
PB: predicated region body
PF: predicated region fallthrough
CT: control target
= control target key end

     0   :  { %7 = vsyncpa [#allocation5], 0  ;;  %s1073_s0 = inlined_call_operand.hbm [shape: f32[2,32,128], index: 0, kind: input, shape index: {}]   ;;  %s1074_s1 = inlined_call_operand.hbm [shape: s8[2,32,128], index: 1, kind: input, shape index: {}]   ;;  %s1075_s2 = inlined_call_operand.hbm [shape: f32[2,1,2,128], index: 2, kind: output, shape index: {}]  }
   0x1   :  { %9 = vsyncpa [#allocation5 + $0x1], 0 }
   0x2   :  { %10 = vsyncpa [#allocation8], 0 }
   0x3   :  { %12 = vsyncpa [#allocation8 + $0x1], 0 }
   0x4   :  { %13 = vsyncpa [#allocation6], 0 }
   0x5   :  { %15 = vsyncpa [#allocation6 + $0x1], 0  ;;  %s839_s9 = smov 0   ;;  %s841_s10 = smov 0  }
   0x6   :  { %s843_s11 = smov 0   ;;  %s845_s12 = smov 0  }
   0x7   :  { %s847_s13 = smov 0   ;;  %s849_s14 = smov 0  }
   0x8 LB: > { %s572_s15 = sadd.s32 4294967295, %s815_s14   ;;  %s573_s16 = sadd.s32 4294967294, %s815_s14   ;;  %s815_s14 = sphi %s849_s14, %s21_s14   ;;  %s811_s13 = sphi %s847_s13, %s1100_s13   ;;  %s807_s12 = sphi %s845_s12, %s1099_s12   ;;  %s803_s11 = sphi %s843_s11, %s1098_s11   ;;  %s799_s10 = sphi %s841_s10, %s1097_s10   ;;  %s795_s9 = sphi %s839_s9, %s1096_s9  }
   0x9   : > { %s40_s17 = sadd.s32 1, %s811_s13  ;;  %s55_s18 = sadd.s32 1, %s803_s11 }
   0xa   : > { %p42_p0 = scmp.ge.s32.totalorder %s40_s17, 2  ;;  %p62_p1 = scmp.ne.s32.totalorder %s803_s11, %s799_s10 }
   0xb   : > { %p63_p2 = scmp.eq.s32.totalorder %s815_s14, 0  ;;  %p68_p3 = scmp.ne.s32.totalorder %s799_s10, %s795_s9 }
   0xc   : > { %s1102_s17 = smov (%p42_p0, %s40_s17), 0  ;;  %p69_p5 = scmp.eq.s32.totalorder %s572_s15, 0 }
   0xd   : > { %p880_p4 = por %p63_p2, %p62_p1  ;;  %s50_s20 = ssub.s32 %s811_s13, %s1102_s17 }
   0xe   : > { %p128_p6 = scmp.eq.s32.totalorder %s572_s15, 1  ;;  %p53_p7 = scmp.eq.s32.totalorder %s50_s20, 0 }
   0xf   : > { %p886_p8 = por %p69_p5, %p68_p3  ;;  %p134_p10 = scmp.eq.s32.totalorder %s573_s16, 1 }
  0x10   : > { %p890_p9 = por %p128_p6, %p62_p1  ;;  %p607_p13 = scmp.lt.s32.totalorder %s815_s14, 2 }
  0x11   : > { %s1079_s21 = scalar_select %p886_p8, 1, 0 }
  0x12   : > { %s1080_s22 = scalar_select %p890_p9, 1, 0 }
  0x13   : > { %s895_s23 = scalar_select %p53_p7, %s803_s11, %s55_s18  }
  0x14   : > { %p897_p11 = por %p134_p10, %p68_p3  ;;  %s904_s25 = sand.u32 1, %s803_s11  }
  0x15   : > { %s576_s26 = sshll.u32 %s904_s25, 5  ;;  %s589_s27 = sshll.u32 %s811_s13, 9 }
  0x16   : > { %s1081_s24 = scalar_select %p897_p11, 1, 0 }
  0x17   : > { %s911_s30 = scalar_lea.hbm %s1073_s0, %s589_s27  ;;  %s158_s3 = scalar_lea.vmem [#allocation4], %s576_s26 }
  0x18   : > { %s170_s4 = sshll.u32 %s158_s3, 4  ;;  %p917_p0 = pnand %p607_p13, %p880_p4  ;;  %s913_s4 = int_to_ptr.vmem [resolvable:$true] %s170_s4 }
  0x19   : > { %s155_s6 = scalar_lea.sflag [#allocation5], %s904_s25  ;;  %s669_s7 = scalar_lea.hbm %s911_s30, 512 }
  0x1a   : > { %p670_p2 = scmp.ne.s32.totalorder %s911_s30, %s669_s7  ;;  %p671_p3 = pneg %p917_p0 }
  0x1b   : > { %s674_s16 = scalar_lea.hbm %s1073_s0, 1024  ;;  %p675_p4 = scmp.lt.u32.totalorder %s911_s30, %s1073_s0 }
  0x1c   : > { %p672_p5 = pnand %p671_p3, %p670_p2  ;;  %p676_p7 = scmp.lt.u32.totalorder %s674_s16, %s669_s7 }
  0x1d   : > { %p678_p13 = scmp.lt.u32.totalorder %s669_s7, %s911_s30 }
  0x1e   : > { %p673_p6 = pneg %p672_p5  ;;  %p677_p10 = por %p676_p7, %p675_p4 }
  0x20   : > { %p679_p12 = por %p678_p13, %p677_p10 }
  0x22   : > { %p680_p1 = pnand %p679_p12, %p673_p6 }
  0x24   : > { %683 = shalt.err (!%p680_p1)
}
  0x25   : > { %s684_s20 = scalar_lea.vmem %s913_s4, 512  ;;  %s817_s26 = smov [#allocation4]  }
  0x26   : > { %p685_p2 = scmp.ne.s32.totalorder %s913_s4, %s684_s20  ;;  %s689_s27 = sshll.u32 %s817_s26, 4  ;;  %s690_s27 = int_to_ptr.vmem [resolvable:$false] %s689_s27 }
  0x27   : > { %s691_s28 = scalar_lea.vmem %s690_s27, 1024  ;;  %p692_p9 = scmp.lt.s32.totalorder %s913_s4, %s690_s27 }
  0x28   : > { %p687_p5 = pnand %p685_p2, %p671_p3  ;;  %p693_p4 = scmp.lt.s32.totalorder %s691_s28, %s684_s20 }
  0x2a   : > { %p688_p11 = pneg %p687_p5  ;;  %p694_p7 = por %p693_p4, %p692_p9 }
  0x2c   : > { %p695_p10 = pnand %p694_p7, %p688_p11 }
  0x2e   : > { %698 = shalt.err (!%p695_p10)
}
  0x2f   : > { %s818_s29 = smov 128   ;;  %s819_s3 = smov 8  }
  0x30   : > { %599 = dma.hbm_to_vmem [thread:$0]  (!%p917_p0), %s911_s30, 512, %s913_s4, %s155_s6, %s818_s29, %s818_s29, %s819_s3  }
  0x31   : > { %p200_p12 = scmp.lt.s32.totalorder %s815_s14, 3  ;;  %s579_s7 = sshll.u32 %s904_s25, 3 }
  0x32   : > { %s580_s8 = sshll.u32 %s811_s13, 7  ;;  %p1083_p9 = scmp.ge.s32.totalorder %s815_s14, 1 }
  0x33   : > { %s962_s19 = scalar_lea.hbm %s1074_s1, %s580_s8  ;;  %s184_s20 = scalar_lea.vmem [#allocation7], %s579_s7 }
  0x34   : > { %p955_p11 = pnand %p1083_p9, %p200_p12  ;;  %s195_s26 = sshll.u32 %s184_s20, 4  ;;  %s196_s26 = int_to_ptr.vmem [resolvable:$true] %s195_s26 }
  0x35   : > { %s181_s30 = scalar_lea.sflag [#allocation8], %s904_s25  ;;  %s699_s4 = scalar_lea.hbm %s962_s19, 128 }
  0x36   : > { %s1084_s15 = scalar_select %p955_p11, 1, 0 }
  0x37   : > { %p700_p1 = scmp.ne.s32.totalorder %s962_s19, %s699_s4  ;;  %s704_s28 = scalar_lea.hbm %s1074_s1, 256 }
  0x38   : > { %p705_p2 = scmp.lt.u32.totalorder %s962_s19, %s1074_s1  ;;  %p706_p5 = scmp.lt.u32.totalorder %s704_s28, %s699_s4 }
  0x39   : > { %p702_p6 = pnand %p700_p1, %p671_p3  ;;  %p708_p7 = scmp.lt.u32.totalorder %s699_s4, %s962_s19 }
  0x3a   : > { %p707_p4 = por %p706_p5, %p705_p2 }
  0x3b   : > { %p703_p13 = pneg %p702_p6 }
  0x3c   : > { %p709_p10 = por %p708_p7, %p707_p4 }
  0x3e   : > { %p710_p12 = pnand %p709_p10, %p703_p13 }
  0x40   : > { %713 = shalt.err (!%p710_p12)
}
  0x41   : > { %s714_s25 = scalar_lea.vmem %s196_s26, 128  ;;  %s820_s7 = smov [#allocation7]  }
  0x42   : > { %p715_p9 = scmp.ne.s32.totalorder %s196_s26, %s714_s25  ;;  %s719_s8 = sshll.u32 %s820_s7, 4  ;;  %s720_s8 = int_to_ptr.vmem [resolvable:$false] %s719_s8 }
  0x43   : > { %s721_s16 = scalar_lea.vmem %s720_s8, 256  ;;  %p722_p8 = scmp.lt.s32.totalorder %s196_s26, %s720_s8 }
  0x44   : > { %p717_p1 = pnand %p715_p9, %p671_p3  ;;  %p723_p11 = scmp.lt.s32.totalorder %s721_s16, %s714_s25 }
  0x46   : > { %p718_p6 = pneg %p717_p1  ;;  %p724_p2 = por %p723_p11, %p722_p8 }
  0x48   : > { %p725_p5 = pnand %p724_p2, %p718_p6 }
  0x4a   : > { %728 = shalt.err (!%p725_p5)
}
  0x4b   : > { %602 = dma.hbm_to_vmem [thread:$0]  (!%p917_p0), %s962_s19, 128, %s196_s26, %s181_s30  }
  0x4c   : > { %p1085_p13 = scmp.ne.s32.totalorder %s1084_s15, 0 }
  0x4d   : > { %s987_s18 = sand.u32 (!%p1085_p13), 1, %s799_s10   ;;  %p1086_p3 = scmp.ne.s32.totalorder (!%p1085_p13), %s1079_s21, 0 }
  0x4e   : > { %204 = sbr.rel (%p1085_p13) target bundleno = 154 (0x9a), region = 28  ;;  %s582_s20 = sshll.u32 (!%p1085_p13), %s987_s18, 5 }
  0x4f   : > { %s207_s4 = scalar_lea.sflag (!%p1085_p13), [#allocation5], %s987_s18  ;;  %s210_s6 = scalar_lea.vmem (!%p1085_p13), [#allocation4], %s582_s20 }
  0x55   : > { %782 = dma.done.wait (%p1086_p3), %s207_s4, 512  }
  0x56   : > { %784 = vsyncadd (%p1086_p3), %s207_s4, 4294966784  ;;  %s583_s5 = sshll.u32 %s987_s18, 3  ;;  %s216_s15 = scalar_lea.sflag [#allocation8], %s987_s18 }
  0x57   : > { %s219_s19 = scalar_lea.vmem [#allocation7], %s583_s5 }
  0x58   : > { %786 = dma.done.wait (%p1086_p3), %s216_s15, 128  }
  0x59   : > { %788 = vsyncadd (%p1086_p3), %s216_s15, 4294967168  ;;  %v821_v0 = vmov 0.0   ;;  %v354_v1 = vlaneseq  ;;  %v262_v3 = vld [vmem:[%s210_s6] sm:$0xff]  ;;  %v263_v4 = vld [vmem:[%s210_s6 + $0x8] sm:$0xff]  ;;  %v822_v16 = vmov 0   ;;  %s584_s21 = sshll.u32 %s987_s18, 1 }
  0x5a   : > { %258 = vst [vmem:[#allocation2] sm:$0x1] %v821_v0  ;;  %259 = vst [vmem:[#allocation3] sm:$0x1] %v821_v0  ;;  %v264_v5 = vld [vmem:[%s210_s6 + $0x10] sm:$0xff]  ;;  %v265_v6 = vld [vmem:[%s210_s6 + $0x18] sm:$0xff] }
  0x5b   : > { %v355_v2 = vshrl.u32 %v354_v1, 7  ;;  %v266_v7 = vmul.f32 0.5, %v262_v3  ;;  %v267_v8 = vmul.f32 0.5, %v263_v4  ;;  %v268_v9 = vmul.f32 0.5, %v264_v5  ;;  %v282_v12 = vld [vmem:[%s219_s19] sm:$0xff]  ;;  %s244_s26 = scalar_lea.vmem [#allocation9], %s584_s21 }
  0x5c   : > { %v269_v10 = vmul.f32 0.5, %v265_v6  ;;  %vm396_vm0 = vnez %v282_v12  ;;  %v364_v15 = vand.u32 127, %v354_v1  ;;  %s463_s30 = sshll.u32 %s244_s26, 4  ;;  %s586_s27 = sshll.u32 %s807_s12, 5  ;;  %s1021_s30 = int_to_ptr.vmem [resolvable:$true] %s463_s30 }
  0x5d   : > { %v356_v11 = vadd.s32 8, %v355_v2  ;;  %661 = vtanh.f32 %v266_v7  ;;  %v357_v13 = vadd.s32 16, %v355_v2  ;;  %v358_v14 = vadd.s32 24, %v355_v2  ;;  %s1026_s3 = scalar_lea.hbm %s1075_s2, %s586_s27  ;;  %s449_s25 = scalar_lea.sflag [#allocation6], %s987_s18 }
  0x5e   : > { %663 = vtanh.f32 %v267_v8  ;;  %v397_v17 = vsel %vm396_vm0, 16843009, %v822_v16  ;;  %v359_v21 = vmul.u32 128, %v355_v2  ;;  %s729_s7 = scalar_lea.vmem %s1021_s30, 32  ;;  %p1093_p0 = scmp.ne.s32.totalorder %s1080_s22, 0 }
  0x5f   : > { %665 = vtanh.f32 %v268_v9  ;;  %v398_v18 = vunpack.c.0.s8 %v397_v17  ;;  %v399_v19 = vunpack.c.1.s8 %v397_v17  ;;  %v400_v20 = vunpack.c.2.s8 %v397_v17  ;;  %p730_p8 = scmp.ne.s32.totalorder %s1021_s30, %s729_s7  ;;  %s823_s12 = smov [#allocation9]  }
  0x60   : > { %667 = vtanh.f32 %v269_v10  ;;  %v360_v22 = vmul.u32 128, %v356_v11  ;;  %v401_v23 = vunpack.c.3.s8 %v397_v17  ;;  %v361_v24 = vmul.u32 128, %v357_v13  ;;  %s733_s8 = sshll.u32 %s823_s12, 4  ;;  %s734_s8 = int_to_ptr.vmem [resolvable:$false] %s733_s8 }
  0x61   : > { %v402_v25 = vpack.c.b16 %v398_v18, %v398_v18  ;;  %v404_v26 = vpack.c.b16 %v399_v19, %v399_v19  ;;  %v406_v27 = vpack.c.b16 %v400_v20, %v400_v20  ;;  %v362_v29 = vmul.u32 128, %v358_v14  ;;  %p731_p11 = pnand %p730_p8, %p1093_p0  ;;  %s735_s16 = scalar_lea.vmem %s734_s8, 64 }
  0x62   : > { %v408_v28 = vpack.c.b16 %v401_v23, %v401_v23  ;;  %v365_v33 = vadd.s32 %v364_v15, %v359_v21  ;;  %v366_v34 = vadd.s32 %v364_v15, %v360_v22  ;;  %v367_v36 = vadd.s32 %v364_v15, %v361_v24  ;;  %p736_p7 = scmp.lt.s32.totalorder %s1021_s30, %s734_s8  ;;  %p737_p10 = scmp.lt.s32.totalorder %s735_s16, %s729_s7 }
  0x63   : > { %v403_v30 = vpack.c.b8 %v402_v25, %v402_v25  ;;  %v405_v31 = vpack.c.b8 %v404_v26, %v404_v26  ;;  %v407_v32 = vpack.c.b8 %v406_v27, %v406_v27  ;;  %v368_v41 = vadd.s32 %v364_v15, %v362_v29  ;;  %v395_v25 = vld [vmem:[#allocation3] sm:$0x1]  ;;  %v379_v26 = vld [vmem:[#allocation2] sm:$0x1]  ;;  %p732_p4 = pneg %p731_p11 }
  0x64   : > { %v409_v35 = vpack.c.b8 %v408_v28, %v408_v28  ;;  %vm371_vm5 = vcmp.lt.s32.totalorder %v365_v33, 2048  ;;  %vm372_vm6 = vcmp.lt.s32.totalorder %v366_v34, 2048  ;;  %vm373_vm7 = vcmp.lt.s32.totalorder %v367_v36, 2048  ;;  %p738_p12 = por %p737_p10, %p736_p7 }
  0x65   : > { %vm410_vm1 = vnez %v403_v30  ;;  %vm411_vm2 = vnez %v405_v31  ;;  %vm412_vm3 = vnez %v407_v32  ;;  %vm374_vm9 = vcmp.lt.s32.totalorder %v368_v41, 2048 }
  0x66   : > { %vm413_vm4 = vnez %v409_v35  ;;  %v414_v37 = vsel %vm410_vm1, 16843009, %v822_v16  ;;  %v415_v38 = vsel %vm411_vm2, 16843009, %v822_v16  ;;  %v416_v39 = vsel %vm412_vm3, 16843009, %v822_v16  ;;  %p739_p9 = pnand %p738_p12, %p732_p4 }
  0x67   : > { %v662_v40 = vpop.eup %661  ;;  %v417_v42 = vsel %vm413_vm4, 16843009, %v822_v16  ;;  %v418_v43 = vunpack.c.0.s8 %v414_v37  ;;  %v419_v44 = vunpack.c.0.s8 %v415_v38  ;;  %v420_v47 = vunpack.c.0.s8 %v416_v39 }
  0x68   : > { %v664_v45 = vpop.eup %663  ;;  %v274_v46 = vmul.f32 0.5, %v662_v40  ;;  %v421_v48 = vunpack.c.0.s8 %v417_v42 }
  0x69   : > { %v666_v49 = vpop.eup %665  ;;  %v275_v50 = vmul.f32 0.5, %v664_v45  ;;  %vm1001_vm8 = vcmp.ne.s32.totalorder %v418_v43, 0  ;;  %vm423_vm10 = vcmp.ne.s32.totalorder %v419_v44, 0  ;;  %vm1005_vm11 = vcmp.ne.s32.totalorder %v420_v47, 0 }
  0x6a   : > { %v668_v51 = vpop.eup %667  ;;  %v276_v52 = vmul.f32 0.5, %v666_v49  ;;  %v278_v53 = vadd.f32 0.5, %v274_v46  ;;  %vm1009_vm12 = vcmp.ne.s32.totalorder %v421_v48, 0 }
  0x6b   : > { %v277_v55 = vmul.f32 0.5, %v668_v51  ;;  %v279_v56 = vadd.f32 0.5, %v275_v50 }
  0x6c   : > { %v280_v57 = vadd.f32 0.5, %v276_v52  ;;  %v375_v58 = vsel %vm371_vm5, %v278_v53, 0.0 }
  0x6d   : > { %v281_v61 = vadd.f32 0.5, %v277_v55  ;;  %v376_v62 = vsel %vm372_vm6, %v279_v56, 0.0  ;;  %v380_v63 = vmul.f32 %v375_v58, %v375_v58  ;;  %v426_v0 = vsel %vm1001_vm8, %v375_v58, 0.0 }
  0x6e   : > { %v377_v1 = vsel %vm373_vm7, %v280_v57, 0.0  ;;  %v381_v2 = vmul.f32 %v376_v62, %v376_v62  ;;  %v427_v3 = vsel %vm423_vm10, %v376_v62, 0.0 }
  0x6f   : > { %v378_v4 = vsel %vm374_vm9, %v281_v61, 0.0  ;;  %v382_v5 = vmul.f32 %v377_v1, %v377_v1  ;;  %v428_v6 = vsel %vm1005_vm11, %v377_v1, 0.0  ;;  %v430_v7 = vadd.f32 %v427_v3, %v426_v0 }
  0x70   : > { %v383_v8 = vmul.f32 %v378_v4, %v378_v4  ;;  %v384_v9 = vadd.f32 %v381_v2, %v380_v63  ;;  %v429_v10 = vsel %vm1009_vm12, %v378_v4, 0.0 }
  0x71   : > { %v431_v11 = vadd.f32 %v430_v7, %v428_v6 }
  0x72   : > { %v385_v12 = vadd.f32 %v384_v9, %v382_v5 }
  0x73   : > { %v432_v13 = vadd.f32 %v431_v11, %v429_v10 }
  0x74   : > { %v386_v14 = vadd.f32 %v385_v12, %v383_v8 }
  0x75   : > { %v433_v15 = vrot.slane %v432_v13, 4 }
  0x76   : > { %v387_v16 = vrot.slane %v386_v14, 4 }
  0x77   : > { %v434_v17 = vadd.f32 %v433_v15, %v432_v13 }
  0x78   : > { %v388_v18 = vadd.f32 %v387_v16, %v386_v14 }
  0x79   : > { %v435_v19 = vrot.slane %v434_v17, 2 }
  0x7a   : > { %v389_v20 = vrot.slane %v388_v18, 2 }
  0x7b   : > { %v436_v21 = vadd.f32 %v435_v19, %v434_v17 }
  0x7c   : > { %v390_v22 = vadd.f32 %v389_v20, %v388_v18 }
  0x7d   : > { %v437_v23 = vrot.slane %v436_v21, 1 }
  0x7e   : > { %v391_v24 = vrot.slane %v390_v22, 1 }
  0x7f   : > { %v438_v27 = vadd.f32 %v437_v23, %v436_v21 }
  0x80   : > { %v392_v28 = vadd.f32 %v391_v24, %v390_v22 }
  0x81   : > { %v439_v29 = vadd.f32 %v438_v27, %v395_v25 }
  0x82   : > { %v393_v30 = vadd.f32 %v392_v28, %v379_v26 }
  0x83   : > { %440 = vst [vmem:[#allocation3] sm:$0x1] %v439_v29 }
  0x84   : > { %394 = vst [vmem:[#allocation2] sm:$0x1] %v393_v30 }
  0x8a   : > { %v446_v31 = vld [vmem:[#allocation3] sm:$0x1] }
  0x8b   : > { %v444_v32 = vld [vmem:[#allocation2] sm:$0x1]  ;;  %447 = vst [vmem:[%s244_s26 + $0x1] sm:$0x1] %v446_v31 }
  0x8c   : > { %445 = vst [vmem:[%s244_s26] sm:$0x1] %v444_v32 }
  0x8d   : > { %742 = shalt.err (!%p739_p9)
}
  0x8e   : > { %s743_s18 = scalar_lea.hbm %s1026_s3, 32  ;;  %s747_s6 = scalar_lea.hbm %s1075_s2, 64 }
  0x8f   : > { %p744_p1 = scmp.ne.s32.totalorder %s1026_s3, %s743_s18  ;;  %p748_p5 = scmp.lt.u32.totalorder %s1026_s3, %s1075_s2 }
  0x90   : > { %p749_p13 = scmp.lt.u32.totalorder %s747_s6, %s743_s18  ;;  %p751_p8 = scmp.lt.u32.totalorder %s743_s18, %s1026_s3 }
  0x91   : > { %p745_p6 = pnand %p744_p1, %p1093_p0 }
  0x92   : > { %p750_p3 = por %p749_p13, %p748_p5 }
  0x93   : > { %p746_p2 = pneg %p745_p6 }
  0x94   : > { %p752_p11 = por %p751_p8, %p750_p3 }
  0x96   : > { %p753_p4 = pnand %p752_p11, %p746_p2 }
  0x98   : > { %756 = shalt.err (!%p753_p4)
}
  0x99   : > { %594 = dma.vmem_to_hbm [thread:$0]  (%p1093_p0), %s1021_s30, 32, %s1026_s3, %s449_s25  }
  0x9a PF: > { %s475_s19 = sand.u32 1, %s795_s9   ;;  %p1094_p7 = scmp.ne.s32.totalorder %s1081_s24, 0 }
  0x9b   : > { %p1095_p10 = scmp.ge.s32.totalorder %s815_s14, 2  ;;  %s476_s21 = scalar_lea.sflag [#allocation6], %s475_s19 }
  0x9d   : > { %p604_p12 = pnand %p1095_p10, %p1094_p7 }
  0x9f   : > { %790 = dma.done.wait (!%p604_p12), %s476_s21, 32  }
  0xa0   : > { %792 = vsyncadd (!%p604_p12), %s476_s21, 4294967264  ;;  %s21_s14 = sadd.s32 1, %s815_s14   ;;  %s1096_s9 = smov %s799_s10 }
  0xa1   : > { %p18_p9 = scmp.ge.s32.totalorder %s21_s14, 4   ;;  %s1097_s10 = smov %s803_s11 }
  0xa2   : > { %s1098_s11 = smov %s895_s23  ;;  %s1099_s12 = smov %s811_s13 }
  0xa3   : > { %s1100_s13 = smov %s1102_s17  ;;  %20 = sbr.rel (!%p18_p9) target bundleno = 8 (0x8), region = 102 }
  0xaa   :  { %481 = vsyncpa [#allocation5], 1 }
  0xab   :  { %483 = vsyncpa [#allocation5 + $0x1], 1 }
  0xac   :  { %484 = vsyncpa [#allocation8], 1 }
  0xad   :  { %486 = vsyncpa [#allocation8 + $0x1], 1 }
  0xae   :  { %487 = vsyncpa [#allocation6], 1 }
  0xaf   :  { %489 = vsyncpa [#allocation6 + $0x1], 1 }

</bundles_post_ra>
